<compile_context>
chip_gen: v6e
topology: v6e:2x2x1
jax: 0.10.0
libtpu: 0.0.40
codegen_flags: <defaults>
</compile_context>

<pallas_src>
import functools

import jax
import jax.numpy as jnp
from jax.experimental import pallas as pl
from jax.experimental.pallas import tpu as pltpu

_EPS = 1.0            # dice smoothing eps of the chosen base_loss
_LANE = 128
_SUBLANE = 8
_TARGET_BLOCK_BYTES = 1 << 20   # ~1 MiB per input block (x2 inputs x2 buffers)


def _dice_rows_kernel(p_ref, t_ref, out_ref, inter_acc, sums_acc, *, s_valid, ts):
    """One (row_tile, spatial_tile) grid step.

    p_ref/t_ref: (Rb, TS) blocks of the flattened (B*C, H*W) inputs.
    out_ref:     (Rb, 1) per-row loss, written only on the last spatial step.
    inter_acc / sums_acc: (Rb, 1) f32 VMEM accumulators, resident across the
    spatial (reduction) axis.
    """
    k = pl.program_id(1)
    nk = pl.num_programs(1)

    @pl.when(k == 0)
    def _():
        inter_acc[...] = jnp.zeros_like(inter_acc)
        sums_acc[...] = jnp.zeros_like(sums_acc)

    p = p_ref[...].astype(jnp.float32)   # (Rb, TS)
    t = t_ref[...].astype(jnp.float32)

    if s_valid % ts != 0:
        # Ragged last spatial tile: zero out-of-bounds lanes (OOB block
        # contents are undefined).  Static Python branch: only traced when a
        # ragged tile actually exists.  VALU work is free slack here.
        col = k * ts + jax.lax.broadcasted_iota(jnp.int32, p.shape, 1)
        valid = col < s_valid
        p = jnp.where(valid, p, 0.0)
        t = jnp.where(valid, t, 0.0)

    # Fused denominator: one cross-lane reduce of (p + t) instead of two.
    # XLU lane reduces ride a separate slot in this memory-bound kernel.
    inter_acc[...] += jnp.sum(p * t, axis=-1, keepdims=True)
    sums_acc[...] += jnp.sum(p + t, axis=-1, keepdims=True)

    @pl.when(k == nk - 1)
    def _():
        dice = (2.0 * inter_acc[...] + _EPS) / (sums_acc[...] + _EPS)
        out_ref[...] = 1.0 - dice


def _pick_row_block(rows: int) -> int:
    """Sublane-aligned divisor of `rows`, preferring >=2 row tiles so the
    'parallel' grid axis can be sharded across two TensorCores (v7x)."""
    if rows % _SUBLANE != 0:
        # Full extent is always a legal block dim.  B*C is small in practice.
        return rows
    best = _SUBLANE
    for cand in range(_SUBLANE, rows // 2 + 1, _SUBLANE):
        if rows % cand == 0:
            best = cand
    return best


def multiclass_segmentation_loss(output: jax.Array, target: jax.Array,
                                 *, target_block_bytes: int = _TARGET_BLOCK_BYTES) -> jax.Array:
    """output, target: [B, C, H, W] float (f32 or bf16) -> scalar float32 loss."""
    B, C, H, W = output.shape
    assert target.shape == output.shape

    rows = B * C
    s = H * W
    # Free reshapes for contiguous NCHW: lane axis becomes the full spatial extent.
    p2 = output.reshape(rows, s)
    t2 = target.reshape(rows, s)

    rb = _pick_row_block(rows)

    # Lane-dense spatial tile: multiple of 128, sized from the actual element
    # width so each input block is ~target_block_bytes (bf16 gets 2x elements).
    itemsize = max(jnp.dtype(output.dtype).itemsize, jnp.dtype(target.dtype).itemsize)
    ts = max(_LANE, (target_block_bytes // (rb * itemsize)) // _LANE * _LANE)
    s_round = -(-s // _LANE) * _LANE
    ts = min(ts, s_round)
    if ts >= s:
        ts = s          # single tile covering the full extent (always legal)
    num_k = -(-s // ts)

    grid = (rows // rb, num_k)

    kernel = functools.partial(_dice_rows_kernel, s_valid=s, ts=ts)

    # Bandwidth-dominated: 2 full reads + a tiny per-row write.
    bytes_accessed = (p2.size * jnp.dtype(p2.dtype).itemsize
                      + t2.size * jnp.dtype(t2.dtype).itemsize
                      + rows * 4)
    cost = pl.CostEstimate(flops=3 * rows * s, transcendentals=0,
                           bytes_accessed=bytes_accessed)

    per_row = pl.pallas_call(
        kernel,
        out_shape=jax.ShapeDtypeStruct((rows, 1), jnp.float32),
        grid_spec=pltpu.PrefetchScalarGridSpec(
            num_scalar_prefetch=0,
            grid=grid,
            in_specs=[
                pl.BlockSpec((rb, ts), lambda r, k: (r, k)),
                pl.BlockSpec((rb, ts), lambda r, k: (r, k)),
            ],
            out_specs=pl.BlockSpec((rb, 1), lambda r, k: (r, 0)),
            scratch_shapes=[
                pltpu.VMEM((rb, 1), jnp.float32),   # intersection partials
                pltpu.VMEM((rb, 1), jnp.float32),   # p_sum + t_sum partials
            ],
        ),
        compiler_params=pltpu.CompilerParams(
            # rows -> megacore-shardable; spatial -> true reduction axis (last).
            dimension_semantics=("parallel", "arbitrary"),
        ),
        cost_estimate=cost,
    )(p2, t2)

    # Reduction('sum') over classes of mean-over-batch base losses:
    #   sum_c mean_b loss[b, c] == sum(per_row) / B   (tiny O(B*C) wrapper reduce)
    return jnp.sum(per_row) / B


def _reference(output, target):
    # Pure-JAX reference of the same semantics (for sanity checking).
    p = output.astype(jnp.float32)
    t = target.astype(jnp.float32)
    inter = jnp.sum(p * t, axis=(2, 3))   # (B, C)
    p_sum = jnp.sum(p, axis=(2, 3))
    t_sum = jnp.sum(t, axis=(2, 3))
    dice = (2.0 * inter + _EPS) / (p_sum + t_sum + _EPS)
    per_class = jnp.mean(1.0 - dice, axis=0)  # mean over batch -> (C,)
    return jnp.sum(per_class)                  # Reduction('sum') over classes


if __name__ == "__main__":
    key = jax.random.PRNGKey(0)
    k1, k2, k3, k4 = jax.random.split(key, 4)

    # Case 1: the module's canonical small shape; single (rows, s) block.
    B, C, H, W = 2, 4, 16, 16
    output = jax.nn.sigmoid(jax.random.normal(k1, (B, C, H, W), jnp.float32))
    target = (jax.random.uniform(k2, (B, C, H, W), jnp.float32) > 0.5).astype(jnp.float32)

    loss = jax.block_until_ready(multiclass_segmentation_loss(output, target))
    ref = jax.block_until_ready(_reference(output, target))
    assert jnp.allclose(loss, ref, rtol=1e-5, atol=1e-5), (loss, ref)

    # Case 2: exercise multi row-tile ("parallel" axis), multiple spatial tiles
    # and the ragged-last-tile mask by forcing a tiny block budget.
    B2, C2, H2, W2 = 4, 4, 20, 20   # rows=16 -> 2 row tiles; s=400 -> 4 tiles of 128
    out2 = jax.nn.sigmoid(jax.random.normal(k3, (B2, C2, H2, W2), jnp.float32))
    tgt2 = (jax.random.uniform(k4, (B2, C2, H2, W2), jnp.float32) > 0.5).astype(jnp.float32)

    loss2 = jax.block_until_ready(
        multiclass_segmentation_loss(out2, tgt2, target_block_bytes=4096))
    ref2 = jax.block_until_ready(_reference(out2, tgt2))
    assert jnp.allclose(loss2, ref2, rtol=1e-5, atol=1e-5), (loss2, ref2)

    # Case 3: bf16 inputs (dtype-aware tile sizing + in-kernel f32 accumulation).
    out3 = out2.astype(jnp.bfloat16)
    tgt3 = tgt2.astype(jnp.bfloat16)
    loss3 = jax.block_until_ready(multiclass_segmentation_loss(out3, tgt3))
    ref3 = jax.block_until_ready(_reference(out3, tgt3))
    assert jnp.allclose(loss3, ref3, rtol=1e-2, atol=1e-2), (loss3, ref3)

    print("KERNEL_OK")
</pallas_src>

<mosaic_0001>
module attributes {stable_mosaic.version = 11 : i64} {
  func.func @_dice_rows_kernel(%arg0: i32, %arg1: i32, %arg2: memref<8x256xf32, #tpu.memory_space<vmem>>, %arg3: memref<8x256xf32, #tpu.memory_space<vmem>>, %arg4: memref<8x1xf32, #tpu.memory_space<vmem>>, %arg5: memref<8x1xf32, #tpu.memory_space<vmem>>, %arg6: memref<8x1xf32, #tpu.memory_space<vmem>>) attributes {dimension_semantics = [#tpu.dimension_semantics<parallel>, #tpu.dimension_semantics<arbitrary>], iteration_bounds = array<i64: 1, 1>, scalar_prefetch = 0 : i64, scratch_operands = 2 : i64, tpu.core_type = #tpu.core_type<tc>, window_params = [{transform_indices = @transform_0, window_bounds = array<i64: 8, 256>}, {transform_indices = @transform_1, window_bounds = array<i64: 8, 256>}, {transform_indices = @transform_2, window_bounds = array<i64: 8, 1>}]} {
    %c0_i32 = arith.constant 0 : i32
    %0 = arith.cmpi eq, %arg1, %c0_i32 : i32
    %1 = arith.extui %0 : i1 to i32
    %c0_i32_0 = arith.constant 0 : i32
    %2 = arith.cmpi ne, %1, %c0_i32_0 : i32
    scf.if %2 {
      %cst_15 = arith.constant 0.000000e+00 : f32
      %20 = vector.broadcast %cst_15 : f32 to vector<8x1xf32>
      %c0_16 = arith.constant 0 : index
      %c0_17 = arith.constant 0 : index
      %21 = vector.load %arg5[%c0_16, %c0_17] : memref<8x1xf32, #tpu.memory_space<vmem>>, vector<8x1xf32>
      tpu.vector_store %arg5[%c0_16, %c0_17], %20 {strides = array<i32>} : memref<8x1xf32, #tpu.memory_space<vmem>>, vector<8x1xf32>,
      %cst_18 = arith.constant 0.000000e+00 : f32
      %22 = vector.broadcast %cst_18 : f32 to vector<8x1xf32>
      %c0_19 = arith.constant 0 : index
      %c0_20 = arith.constant 0 : index
      %23 = vector.load %arg6[%c0_19, %c0_20] : memref<8x1xf32, #tpu.memory_space<vmem>>, vector<8x1xf32>
      tpu.vector_store %arg6[%c0_19, %c0_20], %22 {strides = array<i32>} : memref<8x1xf32, #tpu.memory_space<vmem>>, vector<8x1xf32>,
    } else {
    }
    %c0 = arith.constant 0 : index
    %c0_1 = arith.constant 0 : index
    %3 = vector.load %arg2[%c0, %c0_1] : memref<8x256xf32, #tpu.memory_space<vmem>>, vector<8x256xf32>
    %c0_2 = arith.constant 0 : index
    %c0_3 = arith.constant 0 : index
    %4 = vector.load %arg3[%c0_2, %c0_3] : memref<8x256xf32, #tpu.memory_space<vmem>>, vector<8x256xf32>
    %c0_4 = arith.constant 0 : index
    %c0_5 = arith.constant 0 : index
    %5 = vector.load %arg5[%c0_4, %c0_5] : memref<8x1xf32, #tpu.memory_space<vmem>>, vector<8x1xf32>
    %6 = arith.mulf %3, %4 : vector<8x256xf32>
    %cst = arith.constant dense<0.000000e+00> : vector<8xf32>
    %7 = vector.multi_reduction <add>, %6, %cst [1] : vector<8x256xf32> to vector<8xf32>
    %8 = vector.shape_cast %7 : vector<8xf32> to vector<8x1xf32>
    %9 = arith.addf %5, %8 : vector<8x1xf32>
    %c0_6 = arith.constant 0 : index
    %c0_7 = arith.constant 0 : index
    %10 = vector.load %arg5[%c0_6, %c0_7] : memref<8x1xf32, #tpu.memory_space<vmem>>, vector<8x1xf32>
    tpu.vector_store %arg5[%c0_6, %c0_7], %9 {strides = array<i32>} : memref<8x1xf32, #tpu.memory_space<vmem>>, vector<8x1xf32>,
    %c0_8 = arith.constant 0 : index
    %c0_9 = arith.constant 0 : index
    %11 = vector.load %arg6[%c0_8, %c0_9] : memref<8x1xf32, #tpu.memory_space<vmem>>, vector<8x1xf32>
    %12 = arith.addf %3, %4 : vector<8x256xf32>
    %cst_10 = arith.constant dense<0.000000e+00> : vector<8xf32>
    %13 = vector.multi_reduction <add>, %12, %cst_10 [1] : vector<8x256xf32> to vector<8xf32>
    %14 = vector.shape_cast %13 : vector<8xf32> to vector<8x1xf32>
    %15 = arith.addf %11, %14 : vector<8x1xf32>
    %c0_11 = arith.constant 0 : index
    %c0_12 = arith.constant 0 : index
    %16 = vector.load %arg6[%c0_11, %c0_12] : memref<8x1xf32, #tpu.memory_space<vmem>>, vector<8x1xf32>
    tpu.vector_store %arg6[%c0_11, %c0_12], %15 {strides = array<i32>} : memref<8x1xf32, #tpu.memory_space<vmem>>, vector<8x1xf32>,
    %c0_i32_13 = arith.constant 0 : i32
    %17 = arith.cmpi eq, %arg1, %c0_i32_13 : i32
    %18 = arith.extui %17 : i1 to i32
    %c0_i32_14 = arith.constant 0 : i32
    %19 = arith.cmpi ne, %18, %c0_i32_14 : i32
    scf.if %19 {
      %c0_15 = arith.constant 0 : index
      %c0_16 = arith.constant 0 : index
      %20 = vector.load %arg5[%c0_15, %c0_16] : memref<8x1xf32, #tpu.memory_space<vmem>>, vector<8x1xf32>
      %cst_17 = arith.constant 2.000000e+00 : f32
      %21 = vector.broadcast %cst_17 : f32 to vector<8x1xf32>
      %22 = arith.mulf %21, %20 : vector<8x1xf32>
      %cst_18 = arith.constant 1.000000e+00 : f32
      %23 = vector.broadcast %cst_18 : f32 to vector<8x1xf32>
      %24 = arith.addf %22, %23 : vector<8x1xf32>
      %c0_19 = arith.constant 0 : index
      %c0_20 = arith.constant 0 : index
      %25 = vector.load %arg6[%c0_19, %c0_20] : memref<8x1xf32, #tpu.memory_space<vmem>>, vector<8x1xf32>
      %cst_21 = arith.constant 1.000000e+00 : f32
      %26 = vector.broadcast %cst_21 : f32 to vector<8x1xf32>
      %27 = arith.addf %25, %26 : vector<8x1xf32>
      %28 = arith.divf %24, %27 : vector<8x1xf32>
      %cst_22 = arith.constant 1.000000e+00 : f32
      %29 = vector.broadcast %cst_22 : f32 to vector<8x1xf32>
      %30 = arith.subf %29, %28 : vector<8x1xf32>
      %c0_23 = arith.constant 0 : index
      %c0_24 = arith.constant 0 : index
      %31 = vector.load %arg4[%c0_23, %c0_24] : memref<8x1xf32, #tpu.memory_space<vmem>>, vector<8x1xf32>
      tpu.vector_store %arg4[%c0_23, %c0_24], %30 {strides = array<i32>} : memref<8x1xf32, #tpu.memory_space<vmem>>, vector<8x1xf32>,
    } else {
    }
    return
  }
  func.func @transform_0(%arg0: i32, %arg1: i32) -> (i32, i32) {
    %c0_i32 = arith.constant 0 : i32
    return %arg0, %arg1 : i32, i32
  }
  func.func @transform_1(%arg0: i32, %arg1: i32) -> (i32, i32) {
    %c0_i32 = arith.constant 0 : i32
    return %arg0, %arg1 : i32, i32
  }
  func.func @transform_2(%arg0: i32, %arg1: i32) -> (i32, i32) {
    %c0_i32 = arith.constant 0 : i32
    %c0_i32_0 = arith.constant 0 : i32
    return %arg0, %c0_i32 : i32, i32
  }
}

</mosaic_0001>

<bundles_post_ra>
// kernel: tpu_custom_call.1
= control target key start
LH: loop header
LB: loop body
LE: loop exit
PB: predicated region body
PF: predicated region fallthrough
CT: control target
= control target key end

     0   :  { %7 = vsyncpa [#allocation5], 0  ;;  %s162_s0 = inlined_call_operand.hbm [shape: f32[8,256], index: 0, kind: input, shape index: {}]   ;;  %s163_s1 = inlined_call_operand.hbm [shape: f32[8,256], index: 1, kind: input, shape index: {}]   ;;  %s164_s2 = inlined_call_operand.vmem [shape: f32[8,1], index: 2, kind: output, shape index: {}]  }
   0x1   :  { %8 = vsyncpa [#allocation7], 0  ;;  %s130_s9 = smov [#allocation4]   ;;  %s131_s11 = smov [#allocation6]  }
   0x2   :  { %s15_s10 = sshll.u32 %s130_s9, 4  ;;  %s25_s12 = sshll.u32 %s131_s11, 4  ;;  %s16_s10 = int_to_ptr.vmem [resolvable:$true] %s15_s10  ;;  %s26_s12 = int_to_ptr.vmem [resolvable:$true] %s25_s12 }
   0x3   :  { %s94_s13 = scalar_lea.vmem %s16_s10, 256  ;;  %p99_p1 = scmp.lt.s32.totalorder %s16_s10, %s16_s10 }
   0x4   :  { %p95_p0 = scmp.ne.s32.totalorder %s16_s10, %s94_s13  ;;  %p100_p2 = scmp.lt.s32.totalorder %s94_s13, %s94_s13 }
   0x6   :  { %p101_p3 = por %p100_p2, %p99_p1 }
   0x8   :  { %p102_p4 = pnand %p101_p3, %p95_p0 }
   0xa   :  { %105 = shalt.err (!%p102_p4)
}
   0xb   :  { %18 = dma.hbm_to_vmem [thread:$0]  %s162_s0, 256, %s16_s10, [#allocation5]  }
   0xc   :  { %s114_s16 = scalar_lea.vmem %s26_s12, 256  ;;  %p119_p6 = scmp.lt.s32.totalorder %s26_s12, %s26_s12 }
   0xd   :  { %p115_p5 = scmp.ne.s32.totalorder %s26_s12, %s114_s16  ;;  %p120_p7 = scmp.lt.s32.totalorder %s114_s16, %s114_s16 }
   0xf   :  { %p121_p8 = por %p120_p7, %p119_p6 }
  0x11   :  { %p122_p9 = pnand %p121_p8, %p115_p5 }
  0x13   :  { %125 = shalt.err (!%p122_p9)
}
  0x14   :  { %28 = dma.hbm_to_vmem [thread:$0]  %s163_s1, 256, %s26_s12, [#allocation7]  }
  0x15   :  { %126 = dma.done.wait [#allocation5], 256  }
  0x16   :  { %127 = vsyncadd [#allocation5], 4294967040 }
  0x17   :  { %128 = dma.done.wait [#allocation7], 256  }
  0x18   :  { %129 = vsyncadd [#allocation7], 4294967040  ;;  %vm39_vm0 = vcmask 7168   ;;  %v132_v0 = vmov 0.0   ;;  %v42_v1 = vld [vmem:[#allocation4] sm:$0xff]  ;;  %v43_v2 = vld [vmem:[#allocation4 + $0x8] sm:$0xff] }
  0x19   :  { %41 = vst.msk [vmem:[#allocation3] sm:$0xff] %vm39_vm0, %v132_v0  ;;  %40 = vst.msk [vmem:[#allocation2] sm:$0xff] %vm39_vm0, %v132_v0  ;;  %v44_v3 = vld [vmem:[#allocation6] sm:$0xff]  ;;  %v45_v4 = vld [vmem:[#allocation6 + $0x8] sm:$0xff] }
  0x1a   :  { %v56_v5 = vadd.f32 %v44_v3, %v42_v1  ;;  %v57_v6 = vadd.f32 %v45_v4, %v43_v2  ;;  %v47_v7 = vmul.f32 %v44_v3, %v42_v1  ;;  %v48_v8 = vmul.f32 %v45_v4, %v43_v2 }
  0x1c   :  { %v58_v9 = vadd.f32 %v57_v6, %v56_v5  ;;  %v49_v10 = vadd.f32 %v48_v8, %v47_v7 }
  0x1e   :  { %59 = vadd.xlane.f32.xlu0 %v58_v9 }
  0x20   :  { %v55_v11 = vld [vmem:[#allocation3] sm:$0xff]  ;;  %v46_v14 = vld [vmem:[#allocation2] sm:$0xff] }
  0x22   :  { %50 = vadd.xlane.f32.xlu0 %v49_v10 }
  0xa7   :  { %v60_v12 = vpop.xlane.xlu0 %59 }
  0xa8   :  { %v61_v13 = vadd.f32 %v60_v12, %v55_v11 }
  0xaa   :  { %62 = vst.msk [vmem:[#allocation3] sm:$0xff] %vm39_vm0, %v61_v13 }
  0xab   :  { %v51_v15 = vpop.xlane.xlu0 %50 }
  0xac   :  { %v52_v16 = vadd.f32 %v51_v15, %v46_v14 }
  0xae   :  { %54 = vst.msk [vmem:[#allocation2] sm:$0xff] %vm39_vm0, %v52_v16 }
  0xb1   :  { %v69_v17 = vld [vmem:[#allocation3] sm:$0xff] }
  0xb2   :  { %v70_v18 = vadd.f32 1.0, %v69_v17 }
  0xb4   :  { %84 = vrcp.f32 %v70_v18 }
  0xb5   :  { %v66_v19 = vld [vmem:[#allocation2] sm:$0xff] }
  0xb6   :  { %v67_v20 = vmul.f32 2.0, %v66_v19 }
  0xb8   :  { %v68_v21 = vadd.f32 1.0, %v67_v20 }
  0xc1   :  { %v85_v22 = vpop.eup %84 }
  0xc2   :  { %v72_v23 = vmul.f32 %v85_v22, %v68_v21 }
  0xc4   :  { %v73_v24 = vsub.f32 1.0, %v72_v23 }
  0xc6   :  { %74 = vst.msk [vmem:[%s164_s2] sm:$0xff] %vm39_vm0, %v73_v24 }
  0xc7   :  { %79 = vsyncpa [#allocation5], 1 }
  0xc8   :  { %80 = vsyncpa [#allocation7], 1 }

</bundles_post_ra>
